<compile_context>
chip_gen: v6e
topology: v6e:2x2x1
jax: 0.10.0
libtpu: 0.0.40
codegen_flags: <defaults>
</compile_context>

<pallas_src>
import numpy as np
import jax
import jax.numpy as jnp
from jax import lax
from jax.experimental import pallas as pl
from jax.experimental.pallas import tpu as pltpu

LANES = 128  # lane-dense flat layout: activations reshaped to (R, 128)


# --------------------------------- kernels -----------------------------------
def _awgn_kernel(sigma_ref, x_ref, n_ref, o_ref):
    x = x_ref[...].astype(jnp.float32)                      # (R, 128)
    pwr = jnp.mean(x * x, axis=(0, 1), keepdims=True) * 2.0  # (1, 1)
    inv_sqrt_pwr = lax.rsqrt(pwr)
    sqrt_pwr = jnp.sqrt(pwr)
    sigma = sigma_ref[0]
    tx = x * inv_sqrt_pwr                                    # complex_normalize
    out = (tx + sigma * n_ref[...].astype(jnp.float32)) * sqrt_pwr
    o_ref[...] = out.astype(o_ref.dtype)


def _rayleigh_kernel(sigma_ref, x_ref, n_ref, h_ref, o_ref):
    x = x_ref[...].astype(jnp.float32)                      # (R, 128)
    pwr = jnp.mean(x * x, axis=(0, 1), keepdims=True) * 2.0  # (1, 1)
    inv_sqrt_pwr = lax.rsqrt(pwr)
    sqrt_pwr = jnp.sqrt(pwr)
    sigma = sigma_ref[0]
    tx = x * inv_sqrt_pwr
    out = (tx * h_ref[...].astype(jnp.float32)
           + sigma * n_ref[...].astype(jnp.float32)) * sqrt_pwr
    o_ref[...] = out.astype(o_ref.dtype)


# ------------------------------ pallas wrapper --------------------------------
def channel_forward(x, chan_param, noise, h_half=None, chan_type="awgn"):
    """Pallas equivalent of Channel.forward (avg_pwr=False).

    x         : activation tensor, any shape with size % (2*LANES) == 0
    chan_param: SNR in dB (python float)
    noise     : (R, LANES) standard-normal, rows [0:R/2)=real-half, [R/2:R)=imag-half
    h_half    : (R/2, LANES) rayleigh fade (only for chan_type='rayleigh')
    """
    in_shape = x.shape
    n_elems = int(np.prod(in_shape))
    assert n_elems % (2 * LANES) == 0, "element count must be a multiple of 256"
    # TODO(synk): arbitrary element counts would need padding to a multiple of
    # 2*128 lanes; not needed for this configuration.
    R = n_elems // LANES
    xf = x.astype(jnp.float32).reshape(R, LANES)

    sigma = jnp.asarray(
        [np.sqrt(1.0 / (2.0 * 10.0 ** (chan_param / 10.0)))], jnp.float32)

    smem = pl.BlockSpec(memory_space=pltpu.MemorySpace.SMEM)
    vmem = pl.BlockSpec(memory_space=pltpu.MemorySpace.VMEM)

    if chan_type in (1, "awgn"):
        out = pl.pallas_call(
            _awgn_kernel,
            out_shape=jax.ShapeDtypeStruct((R, LANES), jnp.float32),
            in_specs=[smem, vmem, vmem],
            out_specs=vmem,
        )(sigma, xf, noise)
    elif chan_type in (2, "rayleigh"):
        # same per-complex-element fade on the real and imag halves
        h_full = jnp.concatenate([h_half, h_half], axis=0)   # (R, LANES)
        out = pl.pallas_call(
            _rayleigh_kernel,
            out_shape=jax.ShapeDtypeStruct((R, LANES), jnp.float32),
            in_specs=[smem, vmem, vmem, vmem],
            out_specs=vmem,
        )(sigma, xf, noise, h_full)
    else:
        # TODO(synk): chan_type='none' returns None from the torch forward and the
        # avg_pwr!=False branch is not exercised here; not implemented.
        raise ValueError("chan_type must be 'awgn' or 'rayleigh'")

    return out.reshape(in_shape)


# ------------------------------ pure-JAX reference -----------------------------
def channel_forward_ref(x, chan_param, noise, h_half=None, chan_type="awgn"):
    """Literal re-implementation of the PyTorch forward (real arithmetic)."""
    x = x.astype(jnp.float32)
    pwr = jnp.mean(x ** 2) * 2.0
    channel_tx = x / jnp.sqrt(pwr)
    flat = channel_tx.reshape(-1)
    L = flat.shape[0]
    re, im = flat[: L // 2], flat[L // 2:]
    nflat = noise.reshape(-1)
    nre, nim = nflat[: L // 2], nflat[L // 2:]
    sigma = np.sqrt(1.0 / (2.0 * 10.0 ** (chan_param / 10.0)))
    if chan_type in (1, "awgn"):
        ore, oim = re + sigma * nre, im + sigma * nim
    elif chan_type in (2, "rayleigh"):
        hf = h_half.reshape(-1)
        ore, oim = re * hf + sigma * nre, im * hf + sigma * nim
    else:
        raise ValueError("chan_type must be 'awgn' or 'rayleigh'")
    chan_out = jnp.concatenate([ore, oim]).reshape(x.shape)
    return chan_out * jnp.sqrt(pwr)


# ------------------------------------ main -------------------------------------
if __name__ == "__main__":
    key = jax.random.PRNGKey(0)
    kx, kn_re, kn_im, kh1, kh2 = jax.random.split(key, 5)

    # small shapes consistent with the module (image-like latent, B=2, C=4, 16x16)
    B, C, H, W = 2, 4, 16, 16
    x = jax.random.normal(kx, (B, C, H, W), jnp.float32)
    snr_db = 10.0

    n_elems = B * C * H * W
    R = n_elems // LANES
    # noise for the "real" half rows and the "imag" half rows (same flat layout
    # as the torch code's [:L//2] / [L//2:] split of the flattened tensor)
    noise = jnp.concatenate(
        [jax.random.normal(kn_re, (R // 2, LANES), jnp.float32),
         jax.random.normal(kn_im, (R // 2, LANES), jnp.float32)], axis=0)
    h_half = jnp.sqrt(
        jax.random.normal(kh1, (R // 2, LANES), jnp.float32) ** 2
        + jax.random.normal(kh2, (R // 2, LANES), jnp.float32) ** 2
    ) / np.sqrt(2.0)

    out_awgn = channel_forward(x, snr_db, noise, chan_type="awgn")
    out_ray = channel_forward(x, snr_db, noise, h_half=h_half, chan_type="rayleigh")
    out_awgn, out_ray = jax.block_until_ready((out_awgn, out_ray))

    ref_awgn = channel_forward_ref(x, snr_db, noise, chan_type="awgn")
    ref_ray = channel_forward_ref(x, snr_db, noise, h_half=h_half,
                                  chan_type="rayleigh")

    np.testing.assert_allclose(np.asarray(out_awgn), np.asarray(ref_awgn),
                               atol=1e-4, rtol=1e-4)
    np.testing.assert_allclose(np.asarray(out_ray), np.asarray(ref_ray),
                               atol=1e-4, rtol=1e-4)
    print("KERNEL_OK")
</pallas_src>

<mosaic_0001>
module attributes {stable_mosaic.version = 11 : i64} {
  func.func @_awgn_kernel(%arg0: memref<1xf32, #tpu.memory_space<smem>>, %arg1: memref<16x128xf32, #tpu.memory_space<vmem>>, %arg2: memref<16x128xf32, #tpu.memory_space<vmem>>, %arg3: memref<16x128xf32, #tpu.memory_space<vmem>>) attributes {dimension_semantics = [], scalar_prefetch = 0 : i64, scratch_operands = 0 : i64, tpu.core_type = #tpu.core_type<tc>} {
    %c0 = arith.constant 0 : index
    %c0_0 = arith.constant 0 : index
    %0 = vector.load %arg1[%c0, %c0_0] : memref<16x128xf32, #tpu.memory_space<vmem>>, vector<16x128xf32>
    %1 = arith.mulf %0, %0 : vector<16x128xf32>
    %2 = vector.shape_cast %1 : vector<16x128xf32> to vector<1x16x128xf32>
    %cst = arith.constant dense<0.000000e+00> : vector<1xf32>
    %3 = vector.multi_reduction <add>, %2, %cst [1, 2] : vector<1x16x128xf32> to vector<1xf32>
    %4 = vector.shape_cast %3 : vector<1xf32> to vector<1x1x1xf32>
    %5 = vector.extract %4[0, 0, 0] : f32 from vector<1x1x1xf32>
    %6 = vector.broadcast %5 : f32 to vector<1x1xf32>
    %cst_1 = arith.constant 2.048000e+03 : f32
    %7 = vector.broadcast %cst_1 : f32 to vector<1x1xf32>
    %8 = arith.divf %6, %7 : vector<1x1xf32>
    %cst_2 = arith.constant 2.000000e+00 : f32
    %9 = vector.broadcast %cst_2 : f32 to vector<1x1xf32>
    %10 = arith.mulf %8, %9 : vector<1x1xf32>
    %11 = math.rsqrt %10 : vector<1x1xf32>
    %12 = math.sqrt %10 : vector<1x1xf32>
    %c0_3 = arith.constant 0 : index
    %13 = memref.load %arg0[%c0_3] : memref<1xf32, #tpu.memory_space<smem>>
    %14 = vector.broadcast %11 : vector<1x1xf32> to vector<16x128xf32>
    %15 = arith.mulf %0, %14 : vector<16x128xf32>
    %c0_4 = arith.constant 0 : index
    %c0_5 = arith.constant 0 : index
    %16 = vector.load %arg2[%c0_4, %c0_5] : memref<16x128xf32, #tpu.memory_space<vmem>>, vector<16x128xf32>
    %17 = vector.broadcast %13 : f32 to vector<16x128xf32>
    %18 = arith.mulf %17, %16 : vector<16x128xf32>
    %19 = arith.addf %15, %18 : vector<16x128xf32>
    %20 = vector.broadcast %12 : vector<1x1xf32> to vector<16x128xf32>
    %21 = arith.mulf %19, %20 : vector<16x128xf32>
    %c0_6 = arith.constant 0 : index
    %c0_7 = arith.constant 0 : index
    %22 = vector.load %arg3[%c0_6, %c0_7] : memref<16x128xf32, #tpu.memory_space<vmem>>, vector<16x128xf32>
    tpu.vector_store %arg3[%c0_6, %c0_7], %21 {strides = array<i32>} : memref<16x128xf32, #tpu.memory_space<vmem>>, vector<16x128xf32>,
    return
  }
}

</mosaic_0001>

<bundles_post_ra>
// kernel: tpu_custom_call.1
= control target key start
LH: loop header
LB: loop body
LE: loop exit
PB: predicated region body
PF: predicated region fallthrough
CT: control target
= control target key end

     0   :  { %9 = vsyncpa [#allocation4], 0  ;;  %s223_s0 = inlined_call_operand.<no memory space> [shape: f32[1], index: 0, kind: input, shape index: {}]   ;;  %s224_s1 = inlined_call_operand.hbm [shape: f32[16,128], index: 1, kind: input, shape index: {}]   ;;  %s225_s2 = inlined_call_operand.hbm [shape: f32[16,128], index: 2, kind: input, shape index: {}]   ;;  %s226_s3 = inlined_call_operand.hbm [shape: f32[16,128], index: 3, kind: output, shape index: {}]  }
   0x1   :  { %10 = vsyncpa [#allocation7], 0 }
   0x2   :  { %11 = vsyncpa [#allocation5], 0  ;;  %s177_s12 = smov [#allocation3]  }
   0x3   :  { %s19_s13 = sshll.u32 %s177_s12, 4  ;;  %s20_s13 = int_to_ptr.vmem [resolvable:$true] %s19_s13 }
   0x4   :  { %s119_s14 = scalar_lea.vmem %s20_s13, 256  ;;  %p124_p1 = scmp.lt.s32.totalorder %s20_s13, %s20_s13 }
   0x5   :  { %p120_p0 = scmp.ne.s32.totalorder %s20_s13, %s119_s14  ;;  %p125_p2 = scmp.lt.s32.totalorder %s119_s14, %s119_s14 }
   0x7   :  { %p126_p3 = por %p125_p2, %p124_p1 }
   0x9   :  { %p127_p4 = pnand %p126_p3, %p120_p0 }
   0xb   :  { %130 = shalt.err (!%p127_p4)
}
   0xc   :  { %s178_s15 = smov 128   ;;  %s179_s16 = smov 8  }
   0xd   :  { %25 = dma.hbm_to_vmem [thread:$0]  %s224_s1, 256, %s20_s13, [#allocation4], %s178_s15, %s178_s15, %s179_s16  }
   0xe   :  { %s180_s19 = smov [#allocation6]  }
   0xf   :  { %s31_s20 = sshll.u32 %s180_s19, 4  ;;  %s32_s20 = int_to_ptr.vmem [resolvable:$true] %s31_s20 }
  0x10   :  { %s139_s21 = scalar_lea.vmem %s32_s20, 256  ;;  %p144_p6 = scmp.lt.s32.totalorder %s32_s20, %s32_s20 }
  0x11   :  { %p140_p5 = scmp.ne.s32.totalorder %s32_s20, %s139_s21  ;;  %p145_p7 = scmp.lt.s32.totalorder %s139_s21, %s139_s21 }
  0x13   :  { %p146_p8 = por %p145_p7, %p144_p6 }
  0x15   :  { %p147_p9 = pnand %p146_p8, %p140_p5 }
  0x17   :  { %150 = shalt.err (!%p147_p9)
}
  0x18   :  { %37 = dma.hbm_to_vmem [thread:$0]  %s225_s2, 256, %s32_s20, [#allocation7], %s178_s15, %s178_s15, %s179_s16  }
  0x19   :  { %171 = dma.done.wait [#allocation4], 256  }
  0x1a   :  { %172 = vsyncadd [#allocation4], 4294967040 }
  0x1b   :  { %173 = dma.done.wait [#allocation7], 256  }
  0x1c   :  { %174 = vsyncadd [#allocation7], 4294967040  ;;  %v44_v0 = vld [vmem:[#allocation3] sm:$0xff]  ;;  %v45_v1 = vld [vmem:[#allocation3 + $0x8] sm:$0xff]  ;;  %v75_v17 = vstv %s223_s0  ;;  %s181_s25 = smov [#allocation8]  }
  0x1d   :  { %v46_v2 = vmul.f32 %v44_v0, %v44_v0  ;;  %v47_v3 = vmul.f32 %v45_v1, %v45_v1  ;;  %v73_v15 = vld [vmem:[#allocation6] sm:$0xff]  ;;  %v74_v16 = vld [vmem:[#allocation6 + $0x8] sm:$0xff]  ;;  %s89_s26 = sshll.u32 %s181_s25, 4  ;;  %s90_s26 = int_to_ptr.vmem [resolvable:$true] %s89_s26 }
  0x1e   :  { %v76_v18 = vmul.f32 %v75_v17, %v73_v15  ;;  %v77_v19 = vmul.f32 %v75_v17, %v74_v16  ;;  %s151_s0 = scalar_lea.vmem %s90_s26, 256  ;;  %p156_p11 = scmp.lt.s32.totalorder %s90_s26, %s90_s26 }
  0x1f   :  { %v48_v4 = vadd.f32 %v47_v3, %v46_v2  ;;  %p152_p10 = scmp.ne.s32.totalorder %s90_s26, %s151_s0  ;;  %p157_p12 = scmp.lt.s32.totalorder %s151_s0, %s151_s0 }
  0x21   :  { %49 = vadd.xlane.f32.xlu0 %v48_v4  ;;  %p158_p13 = por %p157_p12, %p156_p11 }
  0x23   :  { %p159_p0 = pnand %p158_p13, %p152_p10 }
  0xaa   :  { %v50_v5 = vpop.xlane.xlu0 %49 }
  0xab   :  { %v51_v6 = vrot.slane %v50_v5, 4 }
  0xad   :  { %v52_v7 = vadd.f32 %v51_v6, %v50_v5 }
  0xaf   :  { %v53_v8 = vrot.slane %v52_v7, 2 }
  0xb1   :  { %v54_v9 = vadd.f32 %v53_v8, %v52_v7 }
  0xb3   :  { %v55_v10 = vrot.slane %v54_v9, 1 }
  0xb5   :  { %v56_v11 = vadd.f32 %v55_v10, %v54_v9 }
  0xb7   :  { %102 = vpush %v56_v11 }
  0xe8   :  { %s103_s1 = spop %102 }
  0xe9   :  { %v58_v12 = vstv %s103_s1 }
  0xea   :  { %v60_v13 = vmul.f32 0.00048828125, %v58_v12 }
  0xec   :  { %v61_v14 = vmul.f32 2.0, %v60_v13 }
  0xee   :  { %109 = vrsqrt.f32 %v61_v14  ;;  %vm65_vm0 = vcmp.eq.f32.partialorder %v61_v14, inf  ;;  %v68_v24 = vand.u32 2147483648, %v61_v14  ;;  %vm67_vm1 = vcmp.eq.f32.partialorder %v61_v14, 0.0 }
  0xfb   :  { %v110_v20 = vpop.eup %109 }
  0xfc   :  { %v64_v21 = vmul.f32 %v110_v20, %v61_v14  ;;  %v71_v22 = vmul.f32 %v110_v20, %v44_v0  ;;  %v72_v23 = vmul.f32 %v110_v20, %v45_v1 }
  0xfe   :  { %v66_v25 = vsel %vm65_vm0, %v61_v14, %v64_v21  ;;  %v78_v26 = vadd.f32 %v76_v18, %v71_v22  ;;  %v79_v27 = vadd.f32 %v77_v19, %v72_v23 }
  0xff   :  { %v69_v28 = vsel %vm67_vm1, %v68_v24, %v66_v25 }
 0x100   :  { %v80_v29 = vmul.f32 %v78_v26, %v69_v28  ;;  %v81_v30 = vmul.f32 %v79_v27, %v69_v28 }
 0x102   :  { %82 = vst [vmem:[#allocation8] sm:$0xff] %v80_v29  ;;  %83 = vst [vmem:[#allocation8 + $0x8] sm:$0xff] %v81_v30 }
 0x103   :  { %162 = shalt.err (!%p159_p0)
}
 0x104   :  { %95 = dma.vmem_to_hbm [thread:$0]  %s90_s26, 256, %s226_s3, [#allocation5], %s178_s15, %s178_s15, %s179_s16  }
 0x105   :  { %175 = dma.done.wait [#allocation5], 256  }
 0x106   :  { %176 = vsyncadd [#allocation5], 4294967040 }
 0x107   :  { %99 = vsyncpa [#allocation4], 1 }
 0x108   :  { %100 = vsyncpa [#allocation7], 1 }
 0x109   :  { %101 = vsyncpa [#allocation5], 1 }

</bundles_post_ra>
